<compile_context>
chip_gen: v6e
topology: v6e:2x2x1
jax: 0.10.0
libtpu: 0.0.40
codegen_flags: <defaults>
</compile_context>

<pallas_src>
import functools

import jax
import jax.numpy as jnp
from jax.experimental import pallas as pl
from jax.experimental.pallas import tpu as pltpu


def _round_up(v, m):
    return (v + m - 1) // m * m


def _pad_to(a, shape):
    pads = [(0, t - s) for s, t in zip(a.shape, shape)]
    if any(hi for _, hi in pads):
        return jnp.pad(a, pads)
    return a


def _parallel_fc_kernel(x_ref, wcat_ref, bcat_ref, w2_ref, b2_ref,
                        level_ref, width_ref, *, c_pad):
    """One batch tile of ParallelFC.

    level = x @ W_level + b_level
    width = (x @ W1 + b1) @ W2 + b2          (requires hid_features == in_features)

    The two x-sourced matmuls are fused into a single MXU pass against the
    concatenated weight W_cat = [W_level | W1]; the wide f32 result is sliced
    (lane-aligned: c_pad is a multiple of 128) into the level pre-activation
    and the hidden activation h.
    """
    x = x_ref[...]

    fused = jnp.dot(x, wcat_ref[...], preferred_element_type=jnp.float32)
    fused = fused + bcat_ref[...]                       # f32 bias add on the VPU

    level = fused[:, :c_pad]                            # (tb, C_pad)
    h = fused[:, c_pad:]                                # (tb, HID_pad)

    width = jnp.dot(h.astype(w2_ref.dtype), w2_ref[...],
                    preferred_element_type=jnp.float32) + b2_ref[...]

    level_ref[...] = level.astype(level_ref.dtype)
    width_ref[...] = width.astype(width_ref.dtype)


def parallel_fc(x, w_level, b_level, w1, b1, w2, b2, *,
                tb_max=256, compute_dtype=jnp.bfloat16):
    """ParallelFC forward.

    x: (B, IN).  Weights are stored transposed vs. PyTorch nn.Linear, i.e.
    (in_features, out_features); biases are (1, out) or (out,).
    Returns (level, width), each (B, C), in x.dtype.
    """
    B, IN = x.shape
    HID = w1.shape[1]
    C = w_level.shape[1]
    if HID != IN:
        # Inherited PyTorch quirk: width_fc's second Linear takes in_features
        # inputs but is fed the hid_features output of the first Linear.
        raise ValueError(
            f"ParallelFC width branch requires hid_features == in_features "
            f"(got hid={HID}, in={IN}).")
    assert w_level.shape == (IN, C) and w2.shape == (IN, C) and w1.shape == (IN, HID)

    out_dtype = x.dtype

    # ---- lane-dense padding of feature dims (multiples of 128) ----
    IN_P = _round_up(IN, 128)
    HID_P = _round_up(HID, 128)
    C_P = _round_up(C, 128)
    CCAT = C_P + HID_P

    # ---- batch tiling (sublane multiple of 8, large M tile) ----
    B8 = _round_up(B, 8)
    tb = min(_round_up(tb_max, 8), B8)
    B_P = _round_up(B8, tb)
    grid = (B_P // tb,)

    # ---- zero-pad / cast operands ----
    x_p = _pad_to(x, (B_P, IN_P)).astype(compute_dtype)
    wcat = jnp.concatenate(
        [_pad_to(w_level, (IN_P, C_P)), _pad_to(w1, (IN_P, HID_P))],
        axis=1).astype(compute_dtype)                                  # (IN_P, C_P+HID_P)
    bcat = jnp.concatenate(
        [_pad_to(b_level.reshape(1, -1), (1, C_P)),
         _pad_to(b1.reshape(1, -1), (1, HID_P))],
        axis=1).astype(jnp.float32)                                    # (1, C_P+HID_P)
    w2_p = _pad_to(w2, (IN_P, C_P)).astype(compute_dtype)
    b2_p = _pad_to(b2.reshape(1, -1), (1, C_P)).astype(jnp.float32)

    # ---- VMEM budget: per-step tiles * double-buffering, 4x headroom ----
    cb = jnp.dtype(compute_dtype).itemsize
    est = (2 * tb * IN_P * cb            # x tile
           + 2 * IN_P * CCAT * cb        # fused weight (resident, 2 bufs by default)
           + 2 * IN_P * C_P * cb         # W2
           + 2 * (CCAT + C_P) * 4        # biases
           + 2 * 2 * tb * C_P * 4        # level / width output tiles
           + 2 * tb * CCAT * 4)          # f32 intermediate
    vmem_limit = int(min(max(4 * est, 32 << 20), 64 << 20))

    resident = lambda i: (0, 0)          # weights/biases resident for every batch tile
    kernel = functools.partial(_parallel_fc_kernel, c_pad=C_P)

    level_p, width_p = pl.pallas_call(
        kernel,
        out_shape=(jax.ShapeDtypeStruct((B_P, C_P), out_dtype),
                   jax.ShapeDtypeStruct((B_P, C_P), out_dtype)),
        grid_spec=pltpu.PrefetchScalarGridSpec(
            num_scalar_prefetch=0,
            grid=grid,                                        # tile over batch only
            in_specs=[
                pl.BlockSpec((tb, IN_P), lambda i: (i, 0)),   # x tile
                pl.BlockSpec((IN_P, CCAT), resident),         # [W_level | W1]
                pl.BlockSpec((1, CCAT), resident),            # [b_level | b1]
                pl.BlockSpec((IN_P, C_P), resident),          # W2
                pl.BlockSpec((1, C_P), resident),             # b2
            ],
            out_specs=[
                pl.BlockSpec((tb, C_P), lambda i: (i, 0)),    # level
                pl.BlockSpec((tb, C_P), lambda i: (i, 0)),    # width
            ],
        ),
        compiler_params=pltpu.CompilerParams(
            dimension_semantics=("parallel",),
            vmem_limit_bytes=vmem_limit,
        ),
    )(x_p, wcat, bcat, w2_p, b2_p)

    # Slice padded batch rows / padded output lanes back off.
    return level_p[:B, :C], width_p[:B, :C]


if __name__ == "__main__":
    def make_params(key, IN, HID, C):
        # nn.Linear-style U(-1/sqrt(fan_in), 1/sqrt(fan_in)) init; weights are
        # stored as (in, out), i.e. the transpose of PyTorch's (out, in).
        ks = jax.random.split(key, 6)
        scale = 1.0 / (IN ** 0.5)
        w_level = jax.random.uniform(ks[0], (IN, C), jnp.float32, -scale, scale)
        b_level = jax.random.uniform(ks[1], (1, C), jnp.float32, -scale, scale)
        w1 = jax.random.uniform(ks[2], (IN, HID), jnp.float32, -scale, scale)
        b1 = jax.random.uniform(ks[3], (1, HID), jnp.float32, -scale, scale)
        w2 = jax.random.uniform(ks[4], (IN, C), jnp.float32, -scale, scale)
        b2 = jax.random.uniform(ks[5], (1, C), jnp.float32, -scale, scale)
        return w_level, b_level, w1, b1, w2, b2

    # Case 1: toy module shapes, bf16 MXU operands with f32 accumulation.
    B, IN, HID, C = 16, 32, 32, 16
    k_x, k_p = jax.random.split(jax.random.PRNGKey(0))
    x = jax.random.normal(k_x, (B, IN), jnp.float32)
    params = make_params(k_p, IN, HID, C)

    level, width = parallel_fc(x, *params)
    jax.block_until_ready((level, width))

    w_level, b_level, w1, b1, w2, b2 = params
    level_ref = x @ w_level + b_level
    width_ref = (x @ w1 + b1) @ w2 + b2
    assert level.shape == (B, C) and width.shape == (B, C)
    assert jnp.allclose(level, level_ref, atol=5e-2, rtol=5e-2)   # bf16 operands
    assert jnp.allclose(width, width_ref, atol=5e-2, rtol=5e-2)

    # Case 2: uneven batch + multi-step grid (exercises padding paths), exact f32.
    B2, IN2, HID2, C2 = 40, 64, 64, 24
    k_x2, k_p2 = jax.random.split(jax.random.PRNGKey(1))
    x2 = jax.random.normal(k_x2, (B2, IN2), jnp.float32)
    params2 = make_params(k_p2, IN2, HID2, C2)

    level2, width2 = parallel_fc(x2, *params2, tb_max=8,
                                 compute_dtype=jnp.float32)
    jax.block_until_ready((level2, width2))

    w_level2, b_level2, w12, b12, w22, b22 = params2
    level2_ref = x2 @ w_level2 + b_level2
    width2_ref = (x2 @ w12 + b12) @ w22 + b22
    assert level2.shape == (B2, C2) and width2.shape == (B2, C2)
    assert jnp.allclose(level2, level2_ref, atol=1e-4, rtol=1e-4)
    assert jnp.allclose(width2, width2_ref, atol=1e-4, rtol=1e-4)

    print("KERNEL_OK")
</pallas_src>

<mosaic_0001>
module attributes {stable_mosaic.version = 11 : i64} {
  func.func @_parallel_fc_kernel(%arg0: i32, %arg1: memref<16x128xbf16, #tpu.memory_space<vmem>>, %arg2: memref<128x256xbf16, #tpu.memory_space<vmem>>, %arg3: memref<1x256xf32, #tpu.memory_space<vmem>>, %arg4: memref<128x128xbf16, #tpu.memory_space<vmem>>, %arg5: memref<1x128xf32, #tpu.memory_space<vmem>>, %arg6: memref<16x128xf32, #tpu.memory_space<vmem>>, %arg7: memref<16x128xf32, #tpu.memory_space<vmem>>) attributes {dimension_semantics = [#tpu.dimension_semantics<parallel>], iteration_bounds = array<i64: 1>, scalar_prefetch = 0 : i64, scratch_operands = 0 : i64, tpu.core_type = #tpu.core_type<tc>, window_params = [{transform_indices = @transform_0, window_bounds = array<i64: 16, 128>}, {pipeline_mode = #tpu.pipeline_mode<synchronous>, transform_indices = @transform_1, window_bounds = array<i64: 128, 256>}, {pipeline_mode = #tpu.pipeline_mode<synchronous>, transform_indices = @transform_2, window_bounds = array<i64: 1, 256>}, {pipeline_mode = #tpu.pipeline_mode<synchronous>, transform_indices = @transform_3, window_bounds = array<i64: 128, 128>}, {pipeline_mode = #tpu.pipeline_mode<synchronous>, transform_indices = @transform_4, window_bounds = array<i64: 1, 128>}, {transform_indices = @transform_5, window_bounds = array<i64: 16, 128>}, {transform_indices = @transform_6, window_bounds = array<i64: 16, 128>}]} {
    %c0 = arith.constant 0 : index
    %c0_0 = arith.constant 0 : index
    %0 = vector.load %arg1[%c0, %c0_0] : memref<16x128xbf16, #tpu.memory_space<vmem>>, vector<16x128xbf16>
    %c0_1 = arith.constant 0 : index
    %c0_2 = arith.constant 0 : index
    %1 = vector.load %arg2[%c0_1, %c0_2] : memref<128x256xbf16, #tpu.memory_space<vmem>>, vector<128x256xbf16>
    %cst = arith.constant dense<0.000000e+00> : vector<16x256xf32>
    %2 = tpu.matmul %0, %1, %cst {dimension_numbers = #tpu.dot_dimension_numbers<[1], [0], [0], [1], [0, 0, 1, 1], [], []>} : vector<16x128xbf16>, vector<128x256xbf16>, vector<16x256xf32> -> vector<16x256xf32>
    %c0_3 = arith.constant 0 : index
    %c0_4 = arith.constant 0 : index
    %3 = vector.load %arg3[%c0_3, %c0_4] : memref<1x256xf32, #tpu.memory_space<vmem>>, vector<1x256xf32>
    %4 = vector.broadcast %3 : vector<1x256xf32> to vector<16x256xf32>
    %5 = arith.addf %2, %4 : vector<16x256xf32>
    %6 = vector.extract_strided_slice %5 {offsets = [0, 0], sizes = [16, 128], strides = [1, 1]} : vector<16x256xf32> to vector<16x128xf32>
    %7 = vector.extract_strided_slice %5 {offsets = [0, 128], sizes = [16, 128], strides = [1, 1]} : vector<16x256xf32> to vector<16x128xf32>
    %8 = arith.truncf %7 : vector<16x128xf32> to vector<16x128xbf16>
    %c0_5 = arith.constant 0 : index
    %c0_6 = arith.constant 0 : index
    %9 = vector.load %arg4[%c0_5, %c0_6] : memref<128x128xbf16, #tpu.memory_space<vmem>>, vector<128x128xbf16>
    %cst_7 = arith.constant dense<0.000000e+00> : vector<16x128xf32>
    %10 = tpu.matmul %8, %9, %cst_7 {dimension_numbers = #tpu.dot_dimension_numbers<[1], [0], [0], [1], [0, 0, 1, 1], [], []>} : vector<16x128xbf16>, vector<128x128xbf16>, vector<16x128xf32> -> vector<16x128xf32>
    %c0_8 = arith.constant 0 : index
    %c0_9 = arith.constant 0 : index
    %11 = vector.load %arg5[%c0_8, %c0_9] : memref<1x128xf32, #tpu.memory_space<vmem>>, vector<1x128xf32>
    %12 = vector.broadcast %11 : vector<1x128xf32> to vector<16x128xf32>
    %13 = arith.addf %10, %12 : vector<16x128xf32>
    %c0_10 = arith.constant 0 : index
    %c0_11 = arith.constant 0 : index
    %14 = vector.load %arg6[%c0_10, %c0_11] : memref<16x128xf32, #tpu.memory_space<vmem>>, vector<16x128xf32>
    tpu.vector_store %arg6[%c0_10, %c0_11], %6 {strides = array<i32>} : memref<16x128xf32, #tpu.memory_space<vmem>>, vector<16x128xf32>,
    %c0_12 = arith.constant 0 : index
    %c0_13 = arith.constant 0 : index
    %15 = vector.load %arg7[%c0_12, %c0_13] : memref<16x128xf32, #tpu.memory_space<vmem>>, vector<16x128xf32>
    tpu.vector_store %arg7[%c0_12, %c0_13], %13 {strides = array<i32>} : memref<16x128xf32, #tpu.memory_space<vmem>>, vector<16x128xf32>,
    return
  }
  func.func @transform_0(%arg0: i32) -> (i32, i32) {
    %c0_i32 = arith.constant 0 : i32
    %c0_i32_0 = arith.constant 0 : i32
    return %arg0, %c0_i32 : i32, i32
  }
  func.func @transform_1(%arg0: i32) -> (i32, i32) {
    %c0_i32 = arith.constant 0 : i32
    %c0_i32_0 = arith.constant 0 : i32
    %c0_i32_1 = arith.constant 0 : i32
    return %c0_i32, %c0_i32_0 : i32, i32
  }
  func.func @transform_2(%arg0: i32) -> (i32, i32) {
    %c0_i32 = arith.constant 0 : i32
    %c0_i32_0 = arith.constant 0 : i32
    %c0_i32_1 = arith.constant 0 : i32
    return %c0_i32, %c0_i32_0 : i32, i32
  }
  func.func @transform_3(%arg0: i32) -> (i32, i32) {
    %c0_i32 = arith.constant 0 : i32
    %c0_i32_0 = arith.constant 0 : i32
    %c0_i32_1 = arith.constant 0 : i32
    return %c0_i32, %c0_i32_0 : i32, i32
  }
  func.func @transform_4(%arg0: i32) -> (i32, i32) {
    %c0_i32 = arith.constant 0 : i32
    %c0_i32_0 = arith.constant 0 : i32
    %c0_i32_1 = arith.constant 0 : i32
    return %c0_i32, %c0_i32_0 : i32, i32
  }
  func.func @transform_5(%arg0: i32) -> (i32, i32) {
    %c0_i32 = arith.constant 0 : i32
    %c0_i32_0 = arith.constant 0 : i32
    return %arg0, %c0_i32 : i32, i32
  }
  func.func @transform_6(%arg0: i32) -> (i32, i32) {
    %c0_i32 = arith.constant 0 : i32
    %c0_i32_0 = arith.constant 0 : i32
    return %arg0, %c0_i32 : i32, i32
  }
}

</mosaic_0001>

<bundles_post_ra>
// kernel: tpu_custom_call.1
= control target key start
LH: loop header
LB: loop body
LE: loop exit
PB: predicated region body
PF: predicated region fallthrough
CT: control target
= control target key end

     0   :  { %12 = vsyncpa [#allocation3], 0  ;;  %s661_s0 = inlined_call_operand.hbm [shape: bf16[16,128], index: 0, kind: input, shape index: {}]   ;;  %s662_s1 = inlined_call_operand.hbm [shape: bf16[128,256], index: 1, kind: input, shape index: {}]   ;;  %s663_s2 = inlined_call_operand.vmem [shape: f32[1,256], index: 2, kind: input, shape index: {}]   ;;  %s664_s3 = inlined_call_operand.hbm [shape: bf16[128,128], index: 3, kind: input, shape index: {}]   ;;  %s665_s4 = inlined_call_operand.vmem [shape: f32[1,128], index: 4, kind: input, shape index: {}]   ;;  %s666_s5 = inlined_call_operand.hbm [shape: f32[16,128], index: 5, kind: output, shape index: {0}]   ;;  %s667_s6 = inlined_call_operand.hbm [shape: f32[16,128], index: 6, kind: output, shape index: {1}]  }
   0x1   :  { %13 = vsyncpa [#allocation6], 0 }
   0x2   :  { %14 = vsyncpa [#allocation4], 0 }
   0x3   :  { %15 = vsyncpa [#allocation10], 0  ;;  %s584_s21 = smov [#allocation5]  }
   0x4   :  { %s33_s22 = sshll.u32 %s584_s21, 4  ;;  %s34_s22 = int_to_ptr.vmem [resolvable:$true] %s33_s22 }
   0x5   :  { %s484_s23 = scalar_lea.vmem %s34_s22, 2048  ;;  %p489_p1 = scmp.lt.s32.totalorder %s34_s22, %s34_s22 }
   0x6   :  { %p485_p0 = scmp.ne.s32.totalorder %s34_s22, %s484_s23  ;;  %p490_p2 = scmp.lt.s32.totalorder %s484_s23, %s484_s23 }
   0x8   :  { %p491_p3 = por %p490_p2, %p489_p1 }
   0xa   :  { %p492_p4 = pnand %p491_p3, %p485_p0 }
   0xc   :  { %495 = shalt.err (!%p492_p4)
}
   0xd   :  { %s585_s24 = smov 128   ;;  %s586_s25 = smov 8  }
   0xe   :  { %39 = dma.hbm_to_vmem [thread:$0]  %s662_s1, 2048, %s34_s22, [#allocation6], %s585_s24, %s585_s24, %s586_s25  }
   0xf   :  { %s587_s28 = smov [#allocation2]  }
  0x10   :  { %s21_s29 = sshll.u32 %s587_s28, 4  ;;  %s22_s29 = int_to_ptr.vmem [resolvable:$true] %s21_s29 }
  0x11   :  { %s504_s30 = scalar_lea.vmem %s22_s29, 128  ;;  %p509_p6 = scmp.lt.s32.totalorder %s22_s29, %s22_s29 }
  0x12   :  { %p505_p5 = scmp.ne.s32.totalorder %s22_s29, %s504_s30  ;;  %p510_p7 = scmp.lt.s32.totalorder %s504_s30, %s504_s30 }
  0x14   :  { %p511_p8 = por %p510_p7, %p509_p6 }
  0x16   :  { %p512_p9 = pnand %p511_p8, %p505_p5 }
  0x18   :  { %515 = shalt.err (!%p512_p9)
}
  0x19   :  { %s588_s7 = smov 64   ;;  %s589_s8 = smov 4  }
  0x1a   :  { %27 = dma.hbm_to_vmem [thread:$0]  %s661_s0, 128, %s22_s29, [#allocation3], %s588_s7, %s588_s7, %s589_s8  }
  0x1b   :  { %s590_s11 = smov [#allocation7]  }
  0x1c   :  { %s47_s12 = sshll.u32 %s590_s11, 4  ;;  %s48_s12 = int_to_ptr.vmem [resolvable:$true] %s47_s12 }
  0x1d   :  { %s524_s1 = scalar_lea.vmem %s48_s12, 1024  ;;  %p529_p11 = scmp.lt.s32.totalorder %s48_s12, %s48_s12 }
  0x1e   :  { %p525_p10 = scmp.ne.s32.totalorder %s48_s12, %s524_s1  ;;  %p530_p12 = scmp.lt.s32.totalorder %s524_s1, %s524_s1 }
  0x20   :  { %p531_p13 = por %p530_p12, %p529_p11 }
  0x22   :  { %p532_p0 = pnand %p531_p13, %p525_p10 }
  0x24   :  { %535 = shalt.err (!%p532_p0)
}
  0x25   :  { %53 = dma.hbm_to_vmem [thread:$0]  %s664_s3, 1024, %s48_s12, [#allocation6], %s588_s7, %s588_s7, %s589_s8  }
  0x26   :  { %576 = dma.done.wait [#allocation3], 128  }
  0x27   :  { %577 = vsyncadd [#allocation3], 4294967168 }
  0x28   :  { %578 = dma.done.wait [#allocation6], 3072  }
  0x29   :  { %579 = vsyncadd [#allocation6], 4294964224  ;;  %v591_v0 = vmov 0   ;;  %v592_v1 = vmov 0.0   ;;  %v443_v2 = vld [vmem:[#allocation5 + $0x74] ss:$8 sps:$4 sm:$0xff]   ;;  %v86_v27 = vlaneseq }
  0x2a   :  { %214 = vmatprep.mubr.bf16.mxu0 %v591_v0  ;;  %411 = vmatprep.subr.bf16.mxu1 %v592_v1  ;;  %v445_v3 = vld [vmem:[#allocation5 + $0x70] ss:$8 sps:$4 sm:$0xff]   ;;  %v446_v4 = vld [vmem:[#allocation5 + $0x64] ss:$8 sps:$4 sm:$0xff]   ;;  %v448_v5 = vld [vmem:[#allocation5 + $0x60] ss:$8 sps:$4 sm:$0xff]  }
  0x2b   :  { %182 = vmatprep.subr.bf16.mxu0 %v443_v2  ;;  %v449_v6 = vld [vmem:[#allocation5 + $0x54] ss:$8 sps:$4 sm:$0xff]   ;;  %v451_v7 = vld [vmem:[#allocation5 + $0x50] ss:$8 sps:$4 sm:$0xff]   ;;  %v452_v8 = vld [vmem:[#allocation5 + $0x44] ss:$8 sps:$4 sm:$0xff]  }
  0x2c   :  { %183 = vmatpush1.bf16.msra.mxu0 %v445_v3  ;;  %v454_v9 = vld [vmem:[#allocation5 + $0x40] ss:$8 sps:$4 sm:$0xff]   ;;  %v455_v10 = vld [vmem:[#allocation5 + $0x34] ss:$8 sps:$4 sm:$0xff]   ;;  %v457_v13 = vld [vmem:[#allocation5 + $0x30] ss:$8 sps:$4 sm:$0xff]  }
  0x2d   :  { %184 = vmatprep.subr.bf16.mxu0 %v446_v4  ;;  %v468_v11 = vld [vmem:[#allocation7 + $0x38] sm:$0xff]   ;;  %v469_v12 = vld [vmem:[#allocation7 + $0x30] sm:$0xff]   ;;  %v458_v14 = vld [vmem:[#allocation5 + $0x24] ss:$8 sps:$4 sm:$0xff]   ;;  %vm593_vm0 = vmmov 0   ;;  %v87_v28 = vshrl.u32 %v86_v27, 7 }
  0x2e   :  { %412 = vmatpush3.bf16.msra.mxu1 %v468_v11  ;;  %v470_v15 = vld [vmem:[#allocation7 + $0x28] sm:$0xff]   ;;  %v461_v17 = vld [vmem:[#allocation5 + $0x14] ss:$8 sps:$4 sm:$0xff]   ;;  %v471_v18 = vld [vmem:[#allocation7 + $0x20] sm:$0xff]   ;;  %427 = vmatprep.mubr.msk.bf16.mxu1 %vm593_vm0, %v592_v1  ;;  %s594_s15 = smov [#allocation8]  }
  0x2f   :  { %413 = vmatprep.subr.bf16.mxu1 %v592_v1  ;;  %v460_v16 = vld [vmem:[#allocation5 + $0x20] ss:$8 sps:$4 sm:$0xff]   ;;  %v463_v19 = vld [vmem:[#allocation5 + $0x10] ss:$8 sps:$4 sm:$0xff]   ;;  %v464_v20 = vld [vmem:[#allocation5 + $0x4] ss:$8 sps:$4 sm:$0xff]  }
  0x30   :  { %185 = vmatpush1.bf16.msra.mxu0 %v448_v5  ;;  %v472_v21 = vld [vmem:[#allocation7 + $0x18] sm:$0xff]   ;;  %v466_v22 = vld [vmem:[#allocation5] ss:$8 sps:$4 sm:$0xff]   ;;  %v473_v24 = vld [vmem:[#allocation7 + $0x10] sm:$0xff]   ;;  %v88_v29 = vsub.s32 0, %v87_v28  ;;  %v92_v32 = vsub.s32 1, %v87_v28 }
  0x31   :  { %186 = vmatprep.subr.bf16.mxu0 %v449_v6  ;;  %v467_v23 = vld [vmem:[#allocation2] sm:$0xff]   ;;  %v474_v25 = vld [vmem:[#allocation7 + $0x8] sm:$0xff]   ;;  %v475_v26 = vld [vmem:[#allocation7] sm:$0xff]   ;;  %s347_s16 = sshll.u32 %s594_s15, 4  ;;  %s348_s16 = int_to_ptr.vmem [resolvable:$true] %s347_s16 }
  0x32   :  { %414 = vmatpush3.bf16.msra.mxu1 %v469_v12  ;;  %v84_v30 = vld [vmem:[%s663_s2] sm:$0x3]  ;;  %s536_s17 = scalar_lea.vmem %s348_s16, 256  ;;  %p541_p2 = scmp.lt.s32.totalorder %s348_s16, %s348_s16 }
  0x33   :  { %415 = vmatprep.subr.bf16.mxu1 %v592_v1  ;;  %v89_v31 = vrot.slane %v84_v30, %v88_v29  ;;  %v93_v36 = vrot.slane %v84_v30, %v92_v32  ;;  %p537_p1 = scmp.ne.s32.totalorder %s348_s16, %s536_s17  ;;  %p542_p3 = scmp.lt.s32.totalorder %s536_s17, %s536_s17 }
  0x34   :  { %187 = vmatpush1.bf16.msra.mxu0 %v451_v7 }
  0x35   :  { %188 = vmatprep.subr.bf16.mxu0 %v452_v8  ;;  %p543_p4 = por %p542_p3, %p541_p2 }
  0x36   :  { %416 = vmatpush3.bf16.msra.mxu1 %v470_v15 }
  0x37   :  { %417 = vmatprep.subr.bf16.mxu1 %v592_v1  ;;  %p544_p5 = pnand %p543_p4, %p537_p1 }
  0x38   :  { %189 = vmatpush1.bf16.msra.mxu0 %v454_v9 }
  0x39   :  { %190 = vmatprep.subr.bf16.mxu0 %v455_v10 }
  0x3a   :  { %418 = vmatpush3.bf16.msra.mxu1 %v471_v18 }
  0x3b   :  { %419 = vmatprep.subr.bf16.mxu1 %v592_v1 }
  0x3c   :  { %191 = vmatpush1.bf16.msra.mxu0 %v457_v13 }
  0x3d   :  { %192 = vmatprep.subr.bf16.mxu0 %v458_v14 }
  0x3e   :  { %420 = vmatpush3.bf16.msra.mxu1 %v472_v21 }
  0x3f   :  { %421 = vmatprep.subr.bf16.mxu1 %v592_v1 }
  0x40   :  { %193 = vmatpush1.bf16.msra.mxu0 %v460_v16 }
  0x41   :  { %194 = vmatprep.subr.bf16.mxu0 %v461_v17 }
  0x42   :  { %422 = vmatpush3.bf16.msra.mxu1 %v473_v24 }
  0x43   :  { %423 = vmatprep.subr.bf16.mxu1 %v592_v1 }
  0x44   :  { %195 = vmatpush1.bf16.msra.mxu0 %v463_v19 }
  0x45   :  { %196 = vmatprep.subr.bf16.mxu0 %v464_v20 }
  0x46   :  { %424 = vmatpush3.bf16.msra.mxu1 %v474_v25 }
  0x47   :  { %425 = vmatprep.subr.bf16.mxu1 %v592_v1 }
  0x48   :  { %197 = vmatpush1.bf16.msra.mxu0 %v466_v22 }
  0x4a   :  { %426 = vmatpush3.bf16.msra.mxu1 %v475_v26 }
  0x4b   :  { %215 = vmatmul.mubr.bf16.vlgmr.msra.gmra.mxu0 %v467_v23 }
 0x10b   :  { %v216_v33 = vpop.f32.mrf.mxu0 }
 0x10c   :  { %v217_v34 = vadd.f32 %v216_v33, %v89_v31 }
 0x10d   :  { %v218_v35 = vpop.f32.mrf.mxu0 }
 0x10e   :  { %338 = vst [vmem:[#allocation8] sm:$0xff] %v217_v34  ;;  %v219_v40 = vadd.f32 %v218_v35, %v93_v36 }
 0x10f   :  { %v220_v37 = vpop.f32.mrf.mxu0 }
 0x110   :  { %v221_v38 = vadd.f32 %v220_v37, %v89_v31 }
 0x111   :  { %v222_v39 = vpop.f32.mrf.mxu0 }
 0x112   :  { %339 = vst [vmem:[#allocation8 + $0x8] sm:$0xff] %v221_v38  ;;  %v223_v41 = vadd.f32 %v222_v39, %v93_v36 }
 0x114   :  { %v225_v42 = vpack.c.bf16 %v223_v41, %v219_v40 }
 0x116   :  { %428 = vmatmul.mubr.bf16.vlgmr.msra.gmra.mxu1 %v225_v42 }
 0x117   :  { %547 = shalt.err (!%p544_p5)
}
 0x118   :  { %353 = dma.vmem_to_hbm [thread:$0]  %s348_s16, 256, %s666_s5, [#allocation4], %s585_s24, %s585_s24, %s586_s25  }
 0x119   :  { %v393_v43 = vld [vmem:[%s665_s4] ss:$0 sm:$0xff]  ;;  %s595_s21 = smov [#allocation9]  }
 0x11a   :  { %s359_s22 = sshll.u32 %s595_s21, 4  ;;  %s360_s22 = int_to_ptr.vmem [resolvable:$true] %s359_s22 }
 0x11b   :  { %s556_s23 = scalar_lea.vmem %s360_s22, 256  ;;  %p561_p7 = scmp.lt.s32.totalorder %s360_s22, %s360_s22 }
 0x11c   :  { %p557_p6 = scmp.ne.s32.totalorder %s360_s22, %s556_s23  ;;  %p562_p8 = scmp.lt.s32.totalorder %s556_s23, %s556_s23 }
 0x11e   :  { %p563_p9 = por %p562_p8, %p561_p7 }
 0x120   :  { %p564_p10 = pnand %p563_p9, %p557_p6 }
 0x1d6   :  { %v331_v44 = vpop.f32.mrf.mxu1 }
 0x1d7   :  { %v332_v45 = vadd.f32 %v393_v43, %v331_v44 }
 0x1d8   :  { %v429_v46 = vpop.f32.mrf.mxu1 }
 0x1d9   :  { %340 = vst [vmem:[#allocation9] sm:$0xff] %v332_v45 }
 0x1da   :  { %v334_v47 = vpop.f32.mrf.mxu1 }
 0x1db   :  { %v335_v48 = vadd.f32 %v393_v43, %v334_v47 }
 0x1dc   :  { %v430_v49 = vpop.f32.mrf.mxu1 }
 0x1dd   :  { %341 = vst [vmem:[#allocation9 + $0x8] sm:$0xff] %v335_v48 }
 0x1de   :  { %567 = shalt.err (!%p564_p10)
}
 0x1df   :  { %365 = dma.vmem_to_hbm [thread:$0]  %s360_s22, 256, %s667_s6, [#allocation10], %s585_s24, %s585_s24, %s586_s25  }
 0x1e0   :  { %580 = dma.done.wait [#allocation4], 256  }
 0x1e1   :  { %581 = vsyncadd [#allocation4], 4294967040 }
 0x1e2   :  { %582 = dma.done.wait [#allocation10], 256  }
 0x1e3   :  { %583 = vsyncadd [#allocation10], 4294967040 }
 0x1e4   :  { %372 = vsyncpa [#allocation3], 1 }
 0x1e5   :  { %373 = vsyncpa [#allocation6], 1 }
 0x1e6   :  { %374 = vsyncpa [#allocation4], 1 }
 0x1e7   :  { %375 = vsyncpa [#allocation10], 1 }

</bundles_post_ra>
